<compile_context>
chip_gen: v6e
topology: v6e:2x2x1
jax: 0.10.0
libtpu: 0.0.40
codegen_flags: <defaults>
</compile_context>

<pallas_src>
import jax
import jax.numpy as jnp
from jax.experimental import pallas as pl
from jax.experimental.pallas import tpu as pltpu


def _nll_kernel(risk_ref, e_ref, t_ref, rp_ref, rt_ref, out_ref, acc_ref):
    # risk_ref, e_ref, t_ref : (TN, 1) f32   (per-sample columns)
    # rp_ref, rt_ref         : (1, TM) f32   (reference rows, lane-dense)
    # out_ref                : (TN, 1) f32
    # acc_ref (scratch)      : (TN, 1) f32   risk-set sum accumulator
    m = pl.program_id(1)

    @pl.when(m == 0)
    def _():
        acc_ref[...] = jnp.zeros_like(acc_ref)

    t = t_ref[...]                          # (TN, 1)
    rt = rt_ref[...]                        # (1, TM)
    hr_refer = jnp.exp(rp_ref[...])         # (1, TM)  (EUP; padded lanes -> 0)

    # Fused mask-and-select: contrib[i, k] = hr_refer[k] if rt[k] >= t[i] else 0
    contrib = jnp.where(rt >= t, hr_refer, 0.0)                     # (TN, TM)
    acc_ref[...] += jnp.sum(contrib, axis=-1, keepdims=True)        # (TN, 1)

    @pl.when(m == pl.num_programs(1) - 1)
    def _():
        risk = risk_ref[...]                                        # (TN, 1)
        e = e_ref[...]                                              # (TN, 1)
        partial_sum = jnp.exp(risk) + acc_ref[...]                  # (TN, 1)
        uncensored = risk - jnp.log(partial_sum)                    # (TN, 1)
        out_ref[...] = -uncensored * e                              # (TN, 1)


def _round_up(x, m):
    return ((x + m - 1) // m) * m


def neg_log_likelihood_per_sample(prediction, targets, time,
                                  refer_prediction, refer_time,
                                  *, tn_max=256, tm_max=512):
    """prediction: (N, 1), targets: (N,), time: (N,),
       refer_prediction: (M, K), refer_time: (M,)  ->  (1, N) float32"""
    N = prediction.shape[0]
    M = refer_prediction.shape[0]

    # Tile sizes: TN multiple of 8 (sublanes), TM multiple of 128 (lanes).
    # Defaults give a <=512 KiB mask slab -> safe on v5e/v6e/v7x VMEM limits.
    TN = min(tn_max, _round_up(N, 8))
    Npad = _round_up(N, TN)
    TM = min(tm_max, _round_up(M, 128))
    Mpad = _round_up(M, TM)

    # Per-sample vectors as columns (sublane axis = N).
    risk = prediction.reshape(N, 1).astype(jnp.float32)
    e = targets.reshape(N, 1).astype(jnp.float32)
    t = time.reshape(N, 1).astype(jnp.float32)
    # Reference vectors as lane-dense rows (lane axis = M).
    rp = refer_prediction[:, 0].reshape(1, M).astype(jnp.float32)
    rt = refer_time.reshape(1, M).astype(jnp.float32)

    if Npad != N:
        risk = jnp.pad(risk, ((0, Npad - N), (0, 0)))
        e = jnp.pad(e, ((0, Npad - N), (0, 0)))
        t = jnp.pad(t, ((0, Npad - N), (0, 0)))
    if Mpad != M:
        # Padded refer entries: exp(-1e30) == 0 and (-1e30 >= t) is False,
        # so they contribute exactly zero to the risk-set sum.
        pad_val = jnp.float32(-1e30)
        rp = jnp.pad(rp, ((0, 0), (0, Mpad - M)), constant_values=pad_val)
        rt = jnp.pad(rt, ((0, 0), (0, Mpad - M)), constant_values=pad_val)

    grid = (Npad // TN, Mpad // TM)

    grid_spec = pltpu.PrefetchScalarGridSpec(
        num_scalar_prefetch=0,
        grid=grid,
        in_specs=[
            pl.BlockSpec((TN, 1), lambda n, m: (n, 0)),   # risk
            pl.BlockSpec((TN, 1), lambda n, m: (n, 0)),   # E
            pl.BlockSpec((TN, 1), lambda n, m: (n, 0)),   # time
            pl.BlockSpec((1, TM), lambda n, m: (0, m)),   # refer_prediction[:,0]
            pl.BlockSpec((1, TM), lambda n, m: (0, m)),   # refer_time
        ],
        out_specs=pl.BlockSpec((TN, 1), lambda n, m: (n, 0)),
        scratch_shapes=[pltpu.VMEM((TN, 1), jnp.float32)],
    )

    out_col = pl.pallas_call(
        _nll_kernel,
        out_shape=jax.ShapeDtypeStruct((Npad, 1), jnp.float32),
        grid_spec=grid_spec,
        compiler_params=pltpu.CompilerParams(
            dimension_semantics=("parallel", "arbitrary"),
            vmem_limit_bytes=32 * 1024 * 1024,
        ),
    )(risk, e, t, rp, rt)

    # (Npad, 1) -> drop padding, present as (1, N) like the PyTorch module.
    return out_col[:N, 0].reshape(1, N)


def _reference(prediction, targets, time, refer_prediction, refer_time):
    # Pure-JAX mirror of the PyTorch forward, for verification.
    risk = prediction.astype(jnp.float32)                       # (N, 1)
    E = targets.astype(jnp.float32)                             # (N,)
    hazard_ratio = jnp.exp(risk)                                # (N, 1)
    hazard_ratio_refer = jnp.exp(refer_prediction[:, 0])        # (M,)
    mat_1 = refer_time.reshape(-1, 1) * jnp.ones((1, risk.shape[0]))
    mat_2 = jnp.ones((refer_prediction.shape[0], 1)) * time.reshape(1, -1)
    mat_all = (mat_1 - mat_2 >= 0).astype(jnp.float32)          # (M, N)
    hr_sum = hazard_ratio_refer.reshape(1, -1) @ mat_all        # (1, N)
    partial_sum = hazard_ratio + hr_sum.T                       # (N, 1)
    uncensored = risk - jnp.log(partial_sum)                    # (N, 1)
    return -uncensored.T * E                                    # (1, N)


if __name__ == "__main__":
    key = jax.random.PRNGKey(0)

    for (N, M) in [(8, 16), (13, 150)]:   # aligned and padding-exercising cases
        k1, k2, k3, k4, k5, key = jax.random.split(key, 6)
        prediction = jax.random.normal(k1, (N, 1), dtype=jnp.float32)
        targets = jax.random.bernoulli(k2, 0.6, (N,)).astype(jnp.float32)
        time = jax.random.uniform(k3, (N,), dtype=jnp.float32,
                                  minval=0.0, maxval=10.0)
        refer_prediction = jax.random.normal(k4, (M, 1), dtype=jnp.float32)
        refer_time = jax.random.uniform(k5, (M,), dtype=jnp.float32,
                                        minval=0.0, maxval=10.0)

        out = neg_log_likelihood_per_sample(prediction, targets, time,
                                            refer_prediction, refer_time)
        out = jax.block_until_ready(out)

        ref = _reference(prediction, targets, time,
                         refer_prediction, refer_time)
        assert out.shape == (1, N)
        assert jnp.allclose(out, ref, rtol=1e-5, atol=1e-5), (N, M, out, ref)

    print("KERNEL_OK")
</pallas_src>

<mosaic_0001>
module attributes {stable_mosaic.version = 11 : i64} {
  func.func @_nll_kernel(%arg0: i32, %arg1: i32, %arg2: memref<8x1xf32, #tpu.memory_space<vmem>>, %arg3: memref<8x1xf32, #tpu.memory_space<vmem>>, %arg4: memref<8x1xf32, #tpu.memory_space<vmem>>, %arg5: memref<1x128xf32, #tpu.memory_space<vmem>>, %arg6: memref<1x128xf32, #tpu.memory_space<vmem>>, %arg7: memref<8x1xf32, #tpu.memory_space<vmem>>, %arg8: memref<8x1xf32, #tpu.memory_space<vmem>>) attributes {dimension_semantics = [#tpu.dimension_semantics<parallel>, #tpu.dimension_semantics<arbitrary>], iteration_bounds = array<i64: 1, 1>, scalar_prefetch = 0 : i64, scratch_operands = 1 : i64, tpu.core_type = #tpu.core_type<tc>, window_params = [{transform_indices = @transform_0, window_bounds = array<i64: 8, 1>}, {transform_indices = @transform_1, window_bounds = array<i64: 8, 1>}, {transform_indices = @transform_2, window_bounds = array<i64: 8, 1>}, {transform_indices = @transform_3, window_bounds = array<i64: 1, 128>}, {transform_indices = @transform_4, window_bounds = array<i64: 1, 128>}, {transform_indices = @transform_5, window_bounds = array<i64: 8, 1>}]} {
    %c0_i32 = arith.constant 0 : i32
    %0 = arith.cmpi eq, %arg1, %c0_i32 : i32
    %1 = arith.extui %0 : i1 to i32
    %c0_i32_0 = arith.constant 0 : i32
    %2 = arith.cmpi ne, %1, %c0_i32_0 : i32
    scf.if %2 {
      %cst_13 = arith.constant 0.000000e+00 : f32
      %22 = vector.broadcast %cst_13 : f32 to vector<8x1xf32>
      %c0_14 = arith.constant 0 : index
      %c0_15 = arith.constant 0 : index
      %23 = vector.load %arg8[%c0_14, %c0_15] : memref<8x1xf32, #tpu.memory_space<vmem>>, vector<8x1xf32>
      tpu.vector_store %arg8[%c0_14, %c0_15], %22 {strides = array<i32>} : memref<8x1xf32, #tpu.memory_space<vmem>>, vector<8x1xf32>,
    } else {
    }
    %c0 = arith.constant 0 : index
    %c0_1 = arith.constant 0 : index
    %3 = vector.load %arg4[%c0, %c0_1] : memref<8x1xf32, #tpu.memory_space<vmem>>, vector<8x1xf32>
    %c0_2 = arith.constant 0 : index
    %c0_3 = arith.constant 0 : index
    %4 = vector.load %arg6[%c0_2, %c0_3] : memref<1x128xf32, #tpu.memory_space<vmem>>, vector<1x128xf32>
    %c0_4 = arith.constant 0 : index
    %c0_5 = arith.constant 0 : index
    %5 = vector.load %arg5[%c0_4, %c0_5] : memref<1x128xf32, #tpu.memory_space<vmem>>, vector<1x128xf32>
    %6 = math.exp %5 : vector<1x128xf32>
    %7 = vector.broadcast %4 : vector<1x128xf32> to vector<8x128xf32>
    %8 = vector.broadcast %3 : vector<8x1xf32> to vector<8x128xf32>
    %9 = arith.cmpf oge, %7, %8 : vector<8x128xf32>
    %cst = arith.constant 0.000000e+00 : f32
    %10 = vector.shape_cast %6 : vector<1x128xf32> to vector<1x128xf32>
    %11 = vector.broadcast %10 : vector<1x128xf32> to vector<8x128xf32>
    %12 = vector.broadcast %cst : f32 to vector<8x128xf32>
    %13 = arith.select %9, %11, %12 : vector<8x128xi1>, vector<8x128xf32>
    %c0_6 = arith.constant 0 : index
    %c0_7 = arith.constant 0 : index
    %14 = vector.load %arg8[%c0_6, %c0_7] : memref<8x1xf32, #tpu.memory_space<vmem>>, vector<8x1xf32>
    %cst_8 = arith.constant dense<0.000000e+00> : vector<8xf32>
    %15 = vector.multi_reduction <add>, %13, %cst_8 [1] : vector<8x128xf32> to vector<8xf32>
    %16 = vector.shape_cast %15 : vector<8xf32> to vector<8x1xf32>
    %17 = arith.addf %14, %16 : vector<8x1xf32>
    %c0_9 = arith.constant 0 : index
    %c0_10 = arith.constant 0 : index
    %18 = vector.load %arg8[%c0_9, %c0_10] : memref<8x1xf32, #tpu.memory_space<vmem>>, vector<8x1xf32>
    tpu.vector_store %arg8[%c0_9, %c0_10], %17 {strides = array<i32>} : memref<8x1xf32, #tpu.memory_space<vmem>>, vector<8x1xf32>,
    %c0_i32_11 = arith.constant 0 : i32
    %19 = arith.cmpi eq, %arg1, %c0_i32_11 : i32
    %20 = arith.extui %19 : i1 to i32
    %c0_i32_12 = arith.constant 0 : i32
    %21 = arith.cmpi ne, %20, %c0_i32_12 : i32
    scf.if %21 {
      %c0_13 = arith.constant 0 : index
      %c0_14 = arith.constant 0 : index
      %22 = vector.load %arg2[%c0_13, %c0_14] : memref<8x1xf32, #tpu.memory_space<vmem>>, vector<8x1xf32>
      %c0_15 = arith.constant 0 : index
      %c0_16 = arith.constant 0 : index
      %23 = vector.load %arg3[%c0_15, %c0_16] : memref<8x1xf32, #tpu.memory_space<vmem>>, vector<8x1xf32>
      %24 = math.exp %22 : vector<8x1xf32>
      %c0_17 = arith.constant 0 : index
      %c0_18 = arith.constant 0 : index
      %25 = vector.load %arg8[%c0_17, %c0_18] : memref<8x1xf32, #tpu.memory_space<vmem>>, vector<8x1xf32>
      %26 = arith.addf %24, %25 : vector<8x1xf32>
      %27 = math.log %26 : vector<8x1xf32>
      %28 = arith.subf %22, %27 : vector<8x1xf32>
      %cst_19 = arith.constant 0.000000e+00 : f32
      %29 = vector.broadcast %cst_19 : f32 to vector<8x1xf32>
      %30 = arith.subf %29, %28 : vector<8x1xf32>
      %31 = arith.mulf %30, %23 : vector<8x1xf32>
      %c0_20 = arith.constant 0 : index
      %c0_21 = arith.constant 0 : index
      %32 = vector.load %arg7[%c0_20, %c0_21] : memref<8x1xf32, #tpu.memory_space<vmem>>, vector<8x1xf32>
      tpu.vector_store %arg7[%c0_20, %c0_21], %31 {strides = array<i32>} : memref<8x1xf32, #tpu.memory_space<vmem>>, vector<8x1xf32>,
    } else {
    }
    return
  }
  func.func @transform_0(%arg0: i32, %arg1: i32) -> (i32, i32) {
    %c0_i32 = arith.constant 0 : i32
    %c0_i32_0 = arith.constant 0 : i32
    return %arg0, %c0_i32 : i32, i32
  }
  func.func @transform_1(%arg0: i32, %arg1: i32) -> (i32, i32) {
    %c0_i32 = arith.constant 0 : i32
    %c0_i32_0 = arith.constant 0 : i32
    return %arg0, %c0_i32 : i32, i32
  }
  func.func @transform_2(%arg0: i32, %arg1: i32) -> (i32, i32) {
    %c0_i32 = arith.constant 0 : i32
    %c0_i32_0 = arith.constant 0 : i32
    return %arg0, %c0_i32 : i32, i32
  }
  func.func @transform_3(%arg0: i32, %arg1: i32) -> (i32, i32) {
    %c0_i32 = arith.constant 0 : i32
    %c0_i32_0 = arith.constant 0 : i32
    return %c0_i32, %arg1 : i32, i32
  }
  func.func @transform_4(%arg0: i32, %arg1: i32) -> (i32, i32) {
    %c0_i32 = arith.constant 0 : i32
    %c0_i32_0 = arith.constant 0 : i32
    return %c0_i32, %arg1 : i32, i32
  }
  func.func @transform_5(%arg0: i32, %arg1: i32) -> (i32, i32) {
    %c0_i32 = arith.constant 0 : i32
    %c0_i32_0 = arith.constant 0 : i32
    return %arg0, %c0_i32 : i32, i32
  }
}

</mosaic_0001>

<bundles_post_ra>
// kernel: tpu_custom_call.1
= control target key start
LH: loop header
LB: loop body
LE: loop exit
PB: predicated region body
PF: predicated region fallthrough
CT: control target
= control target key end

     0   :  { %vm24_vm0 = vcmask 7168   ;;  %v85_v0 = vmov 0   ;;  %v86_v2 = vmov 0.0   ;;  %v44_v5 = vlaneseq  ;;  %s138_s2 = inlined_call_operand.vmem [shape: f32[8,1], index: 2, kind: input, shape index: {}]   ;;  %s139_s3 = inlined_call_operand.vmem [shape: f32[1,128], index: 3, kind: input, shape index: {}]   ;;  %s140_s4 = inlined_call_operand.vmem [shape: f32[1,128], index: 4, kind: input, shape index: {}]   ;;  %s141_s0 = inlined_call_operand.vmem [shape: f32[8,1], index: 0, kind: input, shape index: {}]   ;;  %s142_s1 = inlined_call_operand.vmem [shape: f32[8,1], index: 1, kind: input, shape index: {}]   ;;  %s143_s5 = inlined_call_operand.vmem [shape: f32[8,1], index: 5, kind: output, shape index: {}]  }
   0x1   :  { %78 = vset.pattern.permute.xlu0 %v85_v0  ;;  %v26_v1 = vld [vmem:[%s138_s2] sm:$0xff]  ;;  %25 = vst.msk [vmem:[#allocation2] sm:$0xff] %vm24_vm0, %v86_v2 }
   0x2   :  { %39 = vperm.xlu0 %78, %v26_v1   ;;  %v28_v3 = vld [vmem:[%s139_s3] sm:$0x1]  ;;  %v45_v6 = vshrl.u32 %v44_v5, 7 }
   0x3   :  { %v29_v4 = vmul.f32 1.442695, %v28_v3  ;;  %v75_v9 = vld [vmem:[%s140_s4] ss:$0 sm:$0xff] }
   0x4   :  { %v46_v7 = vsub.s32 0, %v45_v6  ;;  %v59_v13 = vld [vmem:[%s141_s0] sm:$0xff] }
   0x5   :  { %79 = vpow2.f32 %v29_v4  ;;  %v61_v14 = vmul.f32 1.442695, %v59_v13  ;;  %v60_v24 = vld [vmem:[%s142_s1] sm:$0xff] }
   0x7   :  { %81 = vpow2.f32 %v61_v14 }
   0x8   :  { %v50_v15 = vld [vmem:[#allocation2] sm:$0xff] }
  0x12   :  { %v80_v8 = vpop.eup %79 }
  0x13   :  { %v47_v10 = vrot.slane %v80_v8, %v46_v7 }
  0x14   :  { %v82_v18 = vpop.eup %81 }
  0x7d   :  { %v40_v11 = vpop.permute.xlu0 %39 }
  0x7e   :  { %vm42_vm1 = vcmp.ge.f32.partialorder %v75_v9, %v40_v11 }
  0x7f   :  { %v49_v12 = vsel %vm42_vm1, %v47_v10, 0.0 }
  0x80   :  { %51 = vadd.xlane.f32.xlu0 %v49_v12 }
 0x109   :  { %v52_v16 = vpop.xlane.xlu0 %51 }
 0x10a   :  { %v53_v17 = vadd.f32 %v52_v16, %v50_v15 }
 0x10c   :  { %55 = vst.msk [vmem:[#allocation2] sm:$0xff] %vm24_vm0, %v53_v17 }
 0x113   :  { %v63_v19 = vld [vmem:[#allocation2] sm:$0xff] }
 0x114   :  { %v64_v20 = vadd.f32 %v82_v18, %v63_v19 }
 0x116   :  { %83 = vlog2.f32 %v64_v20 }
 0x123   :  { %v84_v21 = vpop.eup %83 }
 0x124   :  { %v66_v22 = vmul.f32 0.6931472, %v84_v21 }
 0x126   :  { %v67_v23 = vsub.f32 %v59_v13, %v66_v22 }
 0x128   :  { %v68_v25 = vsub.f32 0.0, %v67_v23 }
 0x12a   :  { %v69_v26 = vmul.f32 %v68_v25, %v60_v24 }
 0x12c   :  { %70 = vst.msk [vmem:[%s143_s5] sm:$0xff] %vm24_vm0, %v69_v26 }

</bundles_post_ra>
